<compile_context>
chip_gen: v6e
topology: v6e:2x2x1
jax: 0.10.0
libtpu: 0.0.40
codegen_flags: <defaults>
</compile_context>

<pallas_src>
import jax
import jax.numpy as jnp
from jax.experimental import pallas as pl
from jax.experimental.pallas import tpu as pltpu


def _linear_relu_kernel(x_ref, wt_ref, b_ref, o_ref):
    """x: (M, K), wt: (K, N) pre-transposed weight, b: (1, N), o: (M, N)."""
    v1 = jnp.dot(x_ref[...], wt_ref[...], preferred_element_type=jnp.float32)
    v1 = v1 + b_ref[...]
    # v2 = v1 - 0.7071067812 in the PyTorch module is never returned -> elided.
    o_ref[...] = jnp.maximum(v1, 0.0).astype(o_ref.dtype)


_SMALL_BATCH_MAX = 256   # gridless whole-array path up to here
_TILE_M = 2048           # fixed batch tile for the streaming (large-B) path


def make_forward(weight, bias):
    """Build a forward fn with parameter layout fixed ONCE (PyTorch layout in).

    weight: (N, K) = (10, 8), bias: (N,) = (10,).
    Returns forward(x: (B, K) f32) -> (B, N) f32.
    """
    w_t = jnp.asarray(weight, jnp.float32).T                # (K, N), cached
    bias2d = jnp.asarray(bias, jnp.float32).reshape(1, -1)  # (1, N), cached
    K, N = w_t.shape

    def forward(x):
        B = x.shape[0]

        if B <= _SMALL_BATCH_MAX:
            # Gridless: everything (< a few KiB) lives in VMEM; one kernel call,
            # no grid-step / double-buffering machinery. Dispatch-bound at B==1.
            vmem = pl.BlockSpec(memory_space=pltpu.MemorySpace.VMEM)
            return pl.pallas_call(
                _linear_relu_kernel,
                out_shape=jax.ShapeDtypeStruct((B, N), jnp.float32),
                in_specs=[vmem, vmem, vmem],
                out_specs=vmem,
            )(x, w_t, bias2d)

        # Streaming path: fixed big tile + cdiv grid (ragged last tile masked
        # by Pallas). Weight/bias stay resident (replicated blocks).
        tm = _TILE_M
        grid = (pl.cdiv(B, tm),)
        return pl.pallas_call(
            _linear_relu_kernel,
            out_shape=jax.ShapeDtypeStruct((B, N), jnp.float32),
            grid_spec=pl.GridSpec(
                grid=grid,
                in_specs=[
                    pl.BlockSpec((tm, K), lambda i: (i, 0)),
                    pl.BlockSpec((K, N), lambda i: (0, 0)),
                    pl.BlockSpec((1, N), lambda i: (0, 0)),
                ],
                out_specs=pl.BlockSpec((tm, N), lambda i: (i, 0)),
            ),
            compiler_params=pltpu.CompilerParams(
                # v7x: two TensorCores split the batch tiles; no-op on v5e/v6e.
                dimension_semantics=("parallel",),
            ),
        )(x, w_t, bias2d)

    return forward


if __name__ == "__main__":
    key = jax.random.PRNGKey(0)
    kx, kw, kb, kx2, kx3 = jax.random.split(key, 5)

    # Input like torch.randn(1, 8)
    x1 = jax.random.normal(kx, (1, 8), dtype=jnp.float32)

    # Deterministic Linear(8, 10) params (uniform in [-1/sqrt(8), 1/sqrt(8)],
    # matching torch's default init scale).
    bound = 1.0 / jnp.sqrt(8.0)
    weight = jax.random.uniform(kw, (10, 8), minval=-bound, maxval=bound,
                                dtype=jnp.float32)
    bias = jax.random.uniform(kb, (10,), minval=-bound, maxval=bound,
                              dtype=jnp.float32)

    forward = make_forward(weight, bias)  # layout fixes happen once, here

    def ref_fn(x):
        return jnp.maximum(x @ weight.T + bias, 0.0)

    # Primary (spec) shape: B = 1, gridless path.
    out = jax.block_until_ready(forward(x1))
    assert out.shape == (1, 10)
    assert jnp.allclose(out, ref_fn(x1), atol=1e-5, rtol=1e-5)

    # Small-batch gridless path (B = 32): one call, no grid.
    xb = jax.random.normal(kx2, (32, 8), dtype=jnp.float32)
    out_b = jax.block_until_ready(forward(xb))
    assert out_b.shape == (32, 10)
    assert jnp.allclose(out_b, ref_fn(xb), atol=1e-5, rtol=1e-5)

    # Streaming path with a ragged last tile (B = 2500, not a multiple of 2048).
    xl = jax.random.normal(kx3, (2500, 8), dtype=jnp.float32)
    out_l = jax.block_until_ready(forward(xl))
    assert out_l.shape == (2500, 10)
    assert jnp.allclose(out_l, ref_fn(xl), atol=1e-5, rtol=1e-5)

    print("KERNEL_OK")
</pallas_src>

<mosaic_0001>
module attributes {stable_mosaic.version = 11 : i64} {
  func.func @_linear_relu_kernel(%arg0: memref<1x8xf32, #tpu.memory_space<vmem>>, %arg1: memref<8x10xf32, #tpu.memory_space<vmem>>, %arg2: memref<1x10xf32, #tpu.memory_space<vmem>>, %arg3: memref<1x10xf32, #tpu.memory_space<vmem>>) attributes {dimension_semantics = [], scalar_prefetch = 0 : i64, scratch_operands = 0 : i64, tpu.core_type = #tpu.core_type<tc>} {
    %c0 = arith.constant 0 : index
    %c0_0 = arith.constant 0 : index
    %0 = vector.load %arg0[%c0, %c0_0] : memref<1x8xf32, #tpu.memory_space<vmem>>, vector<1x8xf32>
    %c0_1 = arith.constant 0 : index
    %c0_2 = arith.constant 0 : index
    %1 = vector.load %arg1[%c0_1, %c0_2] : memref<8x10xf32, #tpu.memory_space<vmem>>, vector<8x10xf32>
    %cst = arith.constant dense<0.000000e+00> : vector<1x10xf32>
    %2 = tpu.matmul %0, %1, %cst {dimension_numbers = #tpu.dot_dimension_numbers<[1], [0], [0], [1], [0, 0, 1, 1], [], []>} : vector<1x8xf32>, vector<8x10xf32>, vector<1x10xf32> -> vector<1x10xf32>
    %c0_3 = arith.constant 0 : index
    %c0_4 = arith.constant 0 : index
    %3 = vector.load %arg2[%c0_3, %c0_4] : memref<1x10xf32, #tpu.memory_space<vmem>>, vector<1x10xf32>
    %4 = arith.addf %2, %3 : vector<1x10xf32>
    %cst_5 = arith.constant 0.000000e+00 : f32
    %5 = vector.broadcast %cst_5 : f32 to vector<1x10xf32>
    %6 = arith.maximumf %4, %5 : vector<1x10xf32>
    %c0_6 = arith.constant 0 : index
    %c0_7 = arith.constant 0 : index
    %7 = vector.load %arg3[%c0_6, %c0_7] : memref<1x10xf32, #tpu.memory_space<vmem>>, vector<1x10xf32>
    tpu.vector_store %arg3[%c0_6, %c0_7], %6 {strides = array<i32>} : memref<1x10xf32, #tpu.memory_space<vmem>>, vector<1x10xf32>,
    return
  }
}

</mosaic_0001>

<bundles_post_ra>
// kernel: tpu_custom_call.1
= control target key start
LH: loop header
LB: loop body
LE: loop exit
PB: predicated region body
PF: predicated region fallthrough
CT: control target
= control target key end

     0   :  { %8 = vsyncpa [#allocation3], 0  ;;  %s251_s0 = inlined_call_operand.hbm [shape: f32[1,8], index: 0, kind: input, shape index: {}]   ;;  %s252_s1 = inlined_call_operand.hbm [shape: f32[8,10], index: 1, kind: input, shape index: {}]   ;;  %s253_s2 = inlined_call_operand.vmem [shape: f32[1,10], index: 2, kind: input, shape index: {}]   ;;  %s254_s3 = inlined_call_operand.hbm [shape: f32[1,10], index: 3, kind: output, shape index: {}]  }
   0x1   :  { %9 = vsyncpa [#allocation6], 0 }
   0x2   :  { %10 = vsyncpa [#allocation4], 0  ;;  %s214_s12 = smov [#allocation2]   ;;  %s215_s14 = smov [#allocation5]  }
   0x3   :  { %s17_s13 = sshll.u32 %s214_s12, 4  ;;  %s27_s15 = sshll.u32 %s215_s14, 4  ;;  %s18_s13 = int_to_ptr.vmem [resolvable:$true] %s17_s13  ;;  %s28_s15 = int_to_ptr.vmem [resolvable:$true] %s27_s15 }
   0x4   :  { %s156_s16 = scalar_lea.vmem %s18_s13, 16  ;;  %s160_s17 = scalar_lea.vmem %s18_s13, 32 }
   0x5   :  { %p157_p0 = scmp.ne.s32.totalorder %s18_s13, %s156_s16  ;;  %p161_p1 = scmp.lt.s32.totalorder %s18_s13, %s18_s13 }
   0x6   :  { %p162_p2 = scmp.lt.s32.totalorder %s160_s17, %s156_s16 }
   0x8   :  { %p163_p3 = por %p162_p2, %p161_p1 }
   0xa   :  { %p164_p4 = pnand %p163_p3, %p157_p0 }
   0xc   :  { %167 = shalt.err (!%p164_p4)
}
   0xd   :  { %20 = dma.hbm_to_vmem [thread:$0]  %s251_s0, 16, %s18_s13, [#allocation3]  }
   0xe   :  { %s176_s20 = scalar_lea.vmem %s28_s15, 128  ;;  %p181_p6 = scmp.lt.s32.totalorder %s28_s15, %s28_s15 }
   0xf   :  { %p177_p5 = scmp.ne.s32.totalorder %s28_s15, %s176_s20  ;;  %p182_p7 = scmp.lt.s32.totalorder %s176_s20, %s176_s20 }
  0x11   :  { %p183_p8 = por %p182_p7, %p181_p6 }
  0x13   :  { %p184_p9 = pnand %p183_p8, %p177_p5 }
  0x15   :  { %187 = shalt.err (!%p184_p9)
}
  0x16   :  { %30 = dma.hbm_to_vmem [thread:$0]  %s252_s1, 128, %s28_s15, [#allocation6]  }
  0x17   :  { %208 = dma.done.wait [#allocation3], 16  }
  0x18   :  { %209 = vsyncadd [#allocation3], 4294967280 }
  0x19   :  { %210 = dma.done.wait [#allocation6], 128  }
  0x1a   :  { %211 = vsyncadd [#allocation6], 4294967168  ;;  %v216_v0 = vmov 0.0   ;;  %vm217_vm0 = vmmov 0   ;;  %vm42_vm1 = vcmask 64512   ;;  %v40_v1 = vld [vmem:[#allocation5] sm:$0xff] }
  0x1b   :  { %138 = vmatprep.subr.mxu0 %v216_v0  ;;  %140 = vmatprep.mubr.msk.f32.mxu0 %vm217_vm0, %v216_v0  ;;  %v39_v2 = vld [vmem:[#allocation2] sm:$0x1]  ;;  %s218_s24 = smov [#allocation7]   ;;  %vm117_vm2 = vcmask 73728  }
  0x1c   :  { %139 = vmatpush3.msra.mxu0 %v40_v1  ;;  %v41_v3 = vld [vmem:[%s253_s2] sm:$0x1]  ;;  %s125_s1 = sshll.u32 %s218_s24, 4  ;;  %s126_s1 = int_to_ptr.vmem [resolvable:$true] %s125_s1 }
  0x1d   :  { %141 = vmatmul.mubr.msk.f32.vlgmr.msra.gmra.mxu0 %vm42_vm1, %v39_v2  ;;  %s188_s25 = scalar_lea.vmem %s126_s1, 16  ;;  %s192_s26 = scalar_lea.vmem %s126_s1, 32 }
  0x1e   :  { %p189_p10 = scmp.ne.s32.totalorder %s126_s1, %s188_s25  ;;  %p193_p11 = scmp.lt.s32.totalorder %s126_s1, %s126_s1 }
  0x1f   :  { %p194_p12 = scmp.lt.s32.totalorder %s192_s26, %s188_s25 }
  0x21   :  { %p195_p13 = por %p194_p12, %p193_p11 }
  0x23   :  { %p196_p0 = pnand %p195_p13, %p189_p10 }
  0xdd   :  { %v112_v4 = vpop.f32.mrf.mxu0 }
  0xde   :  { %v113_v5 = vadd.f32 %v112_v4, %v41_v3 }
  0xdf   :  { %v142_v6 = vpop.f32.mrf.mxu0 }
  0xe0   :  { %v116_v7 = vmax.f32 %v113_v5, 0.0 }
  0xe2   :  { %118 = vst.msk [vmem:[#allocation7] sm:$0x1] %vm117_vm2, %v116_v7 }
  0xe3   :  { %199 = shalt.err (!%p196_p0)
}
  0xe4   :  { %128 = dma.vmem_to_hbm [thread:$0]  %s126_s1, 16, %s254_s3, [#allocation4]  }
  0xe5   :  { %212 = dma.done.wait [#allocation4], 16  }
  0xe6   :  { %213 = vsyncadd [#allocation4], 4294967280 }
  0xe7   :  { %132 = vsyncpa [#allocation3], 1 }
  0xe8   :  { %133 = vsyncpa [#allocation6], 1 }
  0xe9   :  { %134 = vsyncpa [#allocation4], 1 }

</bundles_post_ra>
